<compile_context>
chip_gen: v7x
topology: tpu7x:2x2x1
jax: 0.10.0
libtpu: 0.0.40
codegen_flags: <defaults>
</compile_context>

<pallas_src>
import math

import jax
import jax.numpy as jnp
from jax import lax
from jax.experimental import pallas as pl
from jax.experimental.pallas import tpu as pltpu


def timestep_embedding_kernel(t_ref, freqs_ref, w1_ref, b1_ref, w2_ref, b2_ref,
                              o_ref):
    # t_ref    : (TB, 1)    f32 timesteps for this batch tile
    # freqs_ref: (1, half)  f32 precomputed sinusoid frequencies
    # w1_ref   : (F, D)     bf16, stored so y = x @ W1 + b1
    # b1_ref   : (1, D)     f32
    # w2_ref   : (D, D)     bf16, stored so y = x @ W2 + b2
    # b2_ref   : (1, D)     f32
    # o_ref    : (TB, D)
    t = t_ref[...]                                      # (TB, 1) f32
    arg = (1000.0 * t) * freqs_ref[...]                 # (TB, half)

    # sin/cos halves are adjacent vregs -> lane concat is free of shuffles.
    emb = jnp.concatenate([jnp.sin(arg), jnp.cos(arg)], axis=-1)   # (TB, F)

    # Layer 1: single full-depth contraction on the MXU, bf16 in / f32 acc.
    h = jnp.dot(emb.astype(w1_ref.dtype), w1_ref[...],
                preferred_element_type=jnp.float32) + b1_ref[...]

    # SiLU: sigmoid rides the EUP slot, one VPU mul.
    h = h * jax.nn.sigmoid(h)

    # Layer 2.
    out = jnp.dot(h.astype(w2_ref.dtype), w2_ref[...],
                  preferred_element_type=jnp.float32) + b2_ref[...]
    o_ref[...] = out.astype(o_ref.dtype)


def timestep_embedding(t, w1, b1, w2, b2, *, block_b=1024,
                       compute_dtype=jnp.bfloat16):
    """TimestepEmbedding forward.

    t : (B,)    float timesteps
    w1: (F, D)  first Linear weight (transpose of torch nn.Linear.weight)
    b1: (D,)
    w2: (D, D)  second Linear weight (transpose of torch nn.Linear.weight)
    b2: (D,)
    returns (B, D) float32
    """
    B = t.shape[0]
    F, D = w1.shape
    assert F % 2 == 0
    half = F // 2
    assert half >= 2, "freq_embed_dim must be >= 4 (module divides by half-1)"
    assert w2.shape == (D, D)

    # Batch tiling:
    #  - tiny B: one grid step (weights resident, no per-step overhead)
    #  - otherwise: >=2 tiles so both v7x TensorCores get work, tiles capped
    #    at block_b and rounded to the sublane multiple.
    if B <= 16:
        tb = B
    else:
        tb = min(block_b, pl.cdiv(B, 2))
        tb = ((tb + 7) // 8) * 8
    grid = (pl.cdiv(B, tb),)

    # Hoisted compile-time-constant frequency table.
    freqs = jnp.exp(jnp.arange(half, dtype=jnp.float32)
                    * (-math.log(10000.0) / (half - 1))).reshape(1, half)

    t2 = t.reshape(B, 1).astype(jnp.float32)
    w1c = w1.astype(compute_dtype)
    w2c = w2.astype(compute_dtype)
    b1r = b1.reshape(1, D).astype(jnp.float32)
    b2r = b2.reshape(1, D).astype(jnp.float32)

    return pl.pallas_call(
        timestep_embedding_kernel,
        out_shape=jax.ShapeDtypeStruct((B, D), jnp.float32),
        grid_spec=pltpu.PrefetchScalarGridSpec(
            num_scalar_prefetch=0,
            grid=grid,
            in_specs=[
                pl.BlockSpec((tb, 1), lambda i: (i, 0)),       # timesteps
                pl.BlockSpec((1, half), lambda i: (0, 0)),     # freqs (resident)
                pl.BlockSpec((F, D), lambda i: (0, 0)),        # W1 (resident)
                pl.BlockSpec((1, D), lambda i: (0, 0)),        # b1
                pl.BlockSpec((D, D), lambda i: (0, 0)),        # W2 (resident)
                pl.BlockSpec((1, D), lambda i: (0, 0)),        # b2
            ],
            out_specs=pl.BlockSpec((tb, D), lambda i: (i, 0)),
        ),
        compiler_params=pltpu.CompilerParams(
            dimension_semantics=("parallel",),
        ),
    )(t2, freqs, w1c, b1r, w2c, b2r)


def timestep_embedding_reference(t, w1, b1, w2, b2):
    F = w1.shape[0]
    half = F // 2
    k = jnp.arange(half, dtype=jnp.float32)
    freqs = jnp.exp(k * (-math.log(10000.0) / (half - 1)))
    arg = 1000.0 * t[:, None] * freqs[None, :]
    emb = jnp.concatenate([jnp.sin(arg), jnp.cos(arg)], axis=-1)
    h = jnp.dot(emb, w1, precision=lax.Precision.HIGHEST) + b1
    h = h * jax.nn.sigmoid(h)
    return jnp.dot(h, w2, precision=lax.Precision.HIGHEST) + b2


if __name__ == "__main__":
    dim = 32              # hidden dim of the MLP output
    freq_embed_dim = 256  # module default

    key = jax.random.PRNGKey(0)
    kt, k1, kb1, k2, kb2 = jax.random.split(key, 5)

    # nn.Linear-style params, stored pre-transposed so y = x @ W + b.
    w1 = jax.random.normal(k1, (freq_embed_dim, dim), dtype=jnp.float32) \
        * (1.0 / math.sqrt(freq_embed_dim))
    b1 = 0.1 * jax.random.normal(kb1, (dim,), dtype=jnp.float32)
    w2 = jax.random.normal(k2, (dim, dim), dtype=jnp.float32) \
        * (1.0 / math.sqrt(dim))
    b2 = 0.1 * jax.random.normal(kb2, (dim,), dtype=jnp.float32)

    # Small case (B=2): single grid step.
    B = 2
    t = jax.random.uniform(kt, (B,), dtype=jnp.float32)
    out = jax.block_until_ready(timestep_embedding(t, w1, b1, w2, b2))
    ref = timestep_embedding_reference(t, w1, b1, w2, b2)
    assert out.shape == (B, dim)
    assert jnp.allclose(out, ref, atol=2e-2, rtol=2e-2), "mismatch (B=2)"

    # Ragged multi-tile case (B=40 -> 2 tiles, last tile partial): exercises
    # the no-pad / no-slice path and the >=2-tile megacore split.
    B2 = 40
    t2 = jax.random.uniform(jax.random.PRNGKey(1), (B2,), dtype=jnp.float32)
    out2 = jax.block_until_ready(timestep_embedding(t2, w1, b1, w2, b2))
    ref2 = timestep_embedding_reference(t2, w1, b1, w2, b2)
    assert out2.shape == (B2, dim)
    assert jnp.allclose(out2, ref2, atol=2e-2, rtol=2e-2), "mismatch (B=40)"

    print("KERNEL_OK")
</pallas_src>

<mosaic_0001>
module attributes {stable_mosaic.version = 11 : i64} {
  func.func @timestep_embedding_kernel(%arg0: i32, %arg1: memref<2x1xf32, #tpu.memory_space<vmem>>, %arg2: memref<1x128xf32, #tpu.memory_space<vmem>>, %arg3: memref<256x32xbf16, #tpu.memory_space<vmem>>, %arg4: memref<1x32xf32, #tpu.memory_space<vmem>>, %arg5: memref<32x32xbf16, #tpu.memory_space<vmem>>, %arg6: memref<1x32xf32, #tpu.memory_space<vmem>>, %arg7: memref<2x32xf32, #tpu.memory_space<vmem>>) attributes {dimension_semantics = [#tpu.dimension_semantics<parallel>], iteration_bounds = array<i64: 1>, scalar_prefetch = 0 : i64, scratch_operands = 0 : i64, tpu.core_type = #tpu.core_type<tc>, window_params = [{transform_indices = @transform_0, window_bounds = array<i64: 2, 1>}, {pipeline_mode = #tpu.pipeline_mode<synchronous>, transform_indices = @transform_1, window_bounds = array<i64: 1, 128>}, {pipeline_mode = #tpu.pipeline_mode<synchronous>, transform_indices = @transform_2, window_bounds = array<i64: 256, 32>}, {pipeline_mode = #tpu.pipeline_mode<synchronous>, transform_indices = @transform_3, window_bounds = array<i64: 1, 32>}, {pipeline_mode = #tpu.pipeline_mode<synchronous>, transform_indices = @transform_4, window_bounds = array<i64: 32, 32>}, {pipeline_mode = #tpu.pipeline_mode<synchronous>, transform_indices = @transform_5, window_bounds = array<i64: 1, 32>}, {transform_indices = @transform_6, window_bounds = array<i64: 2, 32>}]} {
    %c0 = arith.constant 0 : index
    %c0_0 = arith.constant 0 : index
    %0 = vector.load %arg1[%c0, %c0_0] : memref<2x1xf32, #tpu.memory_space<vmem>>, vector<2x1xf32>
    %cst = arith.constant 1.000000e+03 : f32
    %1 = vector.broadcast %cst : f32 to vector<2x1xf32>
    %2 = arith.mulf %1, %0 : vector<2x1xf32>
    %c0_1 = arith.constant 0 : index
    %c0_2 = arith.constant 0 : index
    %3 = vector.load %arg2[%c0_1, %c0_2] : memref<1x128xf32, #tpu.memory_space<vmem>>, vector<1x128xf32>
    %4 = vector.broadcast %2 : vector<2x1xf32> to vector<2x128xf32>
    %5 = vector.broadcast %3 : vector<1x128xf32> to vector<2x128xf32>
    %6 = arith.mulf %4, %5 : vector<2x128xf32>
    %7 = math.sin %6 : vector<2x128xf32>
    %8 = math.cos %6 : vector<2x128xf32>
    %9 = tpu.concatenate %7, %8 in 1 : vector<2x128xf32>, vector<2x128xf32> -> vector<2x256xf32>
    %10 = arith.truncf %9 : vector<2x256xf32> to vector<2x256xbf16>
    %c0_3 = arith.constant 0 : index
    %c0_4 = arith.constant 0 : index
    %11 = vector.load %arg3[%c0_3, %c0_4] : memref<256x32xbf16, #tpu.memory_space<vmem>>, vector<256x32xbf16>
    %cst_5 = arith.constant dense<0.000000e+00> : vector<2x32xf32>
    %12 = tpu.matmul %10, %11, %cst_5 {dimension_numbers = #tpu.dot_dimension_numbers<[1], [0], [0], [1], [0, 0, 1, 1], [], []>} : vector<2x256xbf16>, vector<256x32xbf16>, vector<2x32xf32> -> vector<2x32xf32>
    %c0_6 = arith.constant 0 : index
    %c0_7 = arith.constant 0 : index
    %13 = vector.load %arg4[%c0_6, %c0_7] : memref<1x32xf32, #tpu.memory_space<vmem>>, vector<1x32xf32>
    %14 = vector.broadcast %13 : vector<1x32xf32> to vector<2x32xf32>
    %15 = arith.addf %12, %14 : vector<2x32xf32>
    %16 = arith.negf %15 : vector<2x32xf32>
    %17 = math.exp %16 : vector<2x32xf32>
    %cst_8 = arith.constant 1.000000e+00 : f32
    %18 = vector.broadcast %cst_8 : f32 to vector<2x32xf32>
    %19 = arith.addf %18, %17 : vector<2x32xf32>
    %20 = arith.divf %18, %19 : vector<2x32xf32>
    %21 = arith.mulf %15, %20 : vector<2x32xf32>
    %22 = arith.truncf %21 : vector<2x32xf32> to vector<2x32xbf16>
    %c0_9 = arith.constant 0 : index
    %c0_10 = arith.constant 0 : index
    %23 = vector.load %arg5[%c0_9, %c0_10] : memref<32x32xbf16, #tpu.memory_space<vmem>>, vector<32x32xbf16>
    %cst_11 = arith.constant dense<0.000000e+00> : vector<2x32xf32>
    %24 = tpu.matmul %22, %23, %cst_11 {dimension_numbers = #tpu.dot_dimension_numbers<[1], [0], [0], [1], [0, 0, 1, 1], [], []>} : vector<2x32xbf16>, vector<32x32xbf16>, vector<2x32xf32> -> vector<2x32xf32>
    %c0_12 = arith.constant 0 : index
    %c0_13 = arith.constant 0 : index
    %25 = vector.load %arg6[%c0_12, %c0_13] : memref<1x32xf32, #tpu.memory_space<vmem>>, vector<1x32xf32>
    %26 = vector.broadcast %25 : vector<1x32xf32> to vector<2x32xf32>
    %27 = arith.addf %24, %26 : vector<2x32xf32>
    %c0_14 = arith.constant 0 : index
    %c0_15 = arith.constant 0 : index
    %28 = vector.load %arg7[%c0_14, %c0_15] : memref<2x32xf32, #tpu.memory_space<vmem>>, vector<2x32xf32>
    tpu.vector_store %arg7[%c0_14, %c0_15], %27 {strides = array<i32>} : memref<2x32xf32, #tpu.memory_space<vmem>>, vector<2x32xf32>,
    return
  }
  func.func @transform_0(%arg0: i32) -> (i32, i32) {
    %c0_i32 = arith.constant 0 : i32
    %c0_i32_0 = arith.constant 0 : i32
    return %arg0, %c0_i32 : i32, i32
  }
  func.func @transform_1(%arg0: i32) -> (i32, i32) {
    %c0_i32 = arith.constant 0 : i32
    %c0_i32_0 = arith.constant 0 : i32
    %c0_i32_1 = arith.constant 0 : i32
    return %c0_i32, %c0_i32_0 : i32, i32
  }
  func.func @transform_2(%arg0: i32) -> (i32, i32) {
    %c0_i32 = arith.constant 0 : i32
    %c0_i32_0 = arith.constant 0 : i32
    %c0_i32_1 = arith.constant 0 : i32
    return %c0_i32, %c0_i32_0 : i32, i32
  }
  func.func @transform_3(%arg0: i32) -> (i32, i32) {
    %c0_i32 = arith.constant 0 : i32
    %c0_i32_0 = arith.constant 0 : i32
    %c0_i32_1 = arith.constant 0 : i32
    return %c0_i32, %c0_i32_0 : i32, i32
  }
  func.func @transform_4(%arg0: i32) -> (i32, i32) {
    %c0_i32 = arith.constant 0 : i32
    %c0_i32_0 = arith.constant 0 : i32
    %c0_i32_1 = arith.constant 0 : i32
    return %c0_i32, %c0_i32_0 : i32, i32
  }
  func.func @transform_5(%arg0: i32) -> (i32, i32) {
    %c0_i32 = arith.constant 0 : i32
    %c0_i32_0 = arith.constant 0 : i32
    %c0_i32_1 = arith.constant 0 : i32
    return %c0_i32, %c0_i32_0 : i32, i32
  }
  func.func @transform_6(%arg0: i32) -> (i32, i32) {
    %c0_i32 = arith.constant 0 : i32
    %c0_i32_0 = arith.constant 0 : i32
    return %arg0, %c0_i32 : i32, i32
  }
}

</mosaic_0001>

<bundles_post_ra>
// kernel: tpu_custom_call.1
= control target key start
LH: loop header
LB: loop body
LE: loop exit
PB: predicated region body
PF: predicated region fallthrough
CT: control target
= control target key end

     0   :  { %v644_v1 = vmov 0   ;;  %s788_s0 = inlined_call_operand.vmem [shape: f32[2,1], index: 0, kind: input, shape index: {}]   ;;  %s789_s1 = inlined_call_operand.vmem [shape: f32[1,128], index: 1, kind: input, shape index: {}]   ;;  %s790_s2 = inlined_call_operand.vmem [shape: bf16[256,32], index: 2, kind: input, shape index: {}]   ;;  %s791_s3 = inlined_call_operand.vmem [shape: f32[1,32], index: 3, kind: input, shape index: {}]   ;;  %s792_s4 = inlined_call_operand.vmem [shape: bf16[32,32], index: 4, kind: input, shape index: {}]   ;;  %s793_s5 = inlined_call_operand.vmem [shape: f32[1,32], index: 5, kind: input, shape index: {}]   ;;  %s794_s6 = inlined_call_operand.hbm [shape: f32[2,32], index: 6, kind: output, shape index: {}]  }
   0x1   :  { %v25_v0 = vld [vmem:[%s788_s0] sm:$0x3]  ;;  %593 = vset.pattern.permute.xlu0 %v644_v1 }
   0x2   :  { %v26_v2 = vmul.f32 1000.0, %v25_v0 }
   0x4   :  { %30 = vperm.xlu0 %593, %v26_v2  }
   0x5   :  { %11 = vsyncpa [#allocation3], 0  ;;  %v594_v3 = vld [vmem:[%s790_s2 + $0x40] sm:$0xff]   ;;  %v596_v5 = vld [vmem:[%s790_s2 + $0x48] sm:$0xff]   ;;  %v645_v33 = vmov 2102212464  }
   0x6   :  { %v595_v4 = vld [vmem:[%s790_s2] sm:$0xff]   ;;  %546 = vmatprep.subr.bf16.mxu0 %v594_v3  ;;  %v597_v6 = vld [vmem:[%s790_s2 + $0x8] sm:$0xff]   ;;  %v598_v7 = vld [vmem:[%s790_s2 + $0x50] sm:$0xff]   ;;  %v646_v35 = vmov 920167782  }
   0x7   :  { %547 = vmatpush3.bf16.msra.mxu0 %v595_v4  ;;  %v599_v8 = vld [vmem:[%s790_s2 + $0x10] sm:$0xff]   ;;  %v600_v9 = vld [vmem:[%s790_s2 + $0x58] sm:$0xff]   ;;  %v602_v11 = vld [vmem:[%s790_s2 + $0x60] sm:$0xff]   ;;  %v647_v39 = vmov 1326507024  }
   0x8   :  { %548 = vmatprep.subr.bf16.mxu0 %v596_v5  ;;  %v601_v10 = vld [vmem:[%s790_s2 + $0x18] sm:$0xff]   ;;  %v603_v12 = vld [vmem:[%s790_s2 + $0x20] sm:$0xff]   ;;  %v604_v13 = vld [vmem:[%s790_s2 + $0x68] sm:$0xff]   ;;  %v648_v41 = vmov 683565275  }
   0x9   :  { %v605_v14 = vld [vmem:[%s790_s2 + $0x28] sm:$0xff]   ;;  %v606_v15 = vld [vmem:[%s790_s2 + $0x70] sm:$0xff]   ;;  %v608_v17 = vld [vmem:[%s790_s2 + $0x78] sm:$0xff]   ;;  %v649_v43 = vmov 2475754826  }
   0xa   :  { %v607_v16 = vld [vmem:[%s790_s2 + $0x30] sm:$0xff]   ;;  %v609_v18 = vld [vmem:[%s790_s2 + $0x38] sm:$0xff]   ;;  %v515_v19 = vld [vmem:[%s789_s1] ss:$0 sm:$0xff]  ;;  %v650_v46 = vmov 2131351028  }
   0xb   :  { %549 = vmatpush3.bf16.msra.mxu0 %v597_v6 }
   0xc   :  { %550 = vmatprep.subr.bf16.mxu0 %v598_v7 }
   0xf   :  { %551 = vmatpush3.bf16.msra.mxu0 %v599_v8 }
  0x10   :  { %552 = vmatprep.subr.bf16.mxu0 %v600_v9 }
  0x13   :  { %553 = vmatpush3.bf16.msra.mxu0 %v601_v10 }
  0x14   :  { %554 = vmatprep.subr.bf16.mxu0 %v602_v11 }
  0x17   :  { %555 = vmatpush3.bf16.msra.mxu0 %v603_v12 }
  0x18   :  { %556 = vmatprep.subr.bf16.mxu0 %v604_v13 }
  0x1b   :  { %557 = vmatpush3.bf16.msra.mxu0 %v605_v14 }
  0x1c   :  { %558 = vmatprep.subr.bf16.mxu0 %v606_v15 }
  0x1f   :  { %559 = vmatpush3.bf16.msra.mxu0 %v607_v16 }
  0x20   :  { %560 = vmatprep.subr.bf16.mxu0 %v608_v17 }
  0x23   :  { %561 = vmatpush3.bf16.msra.mxu0 %v609_v18 }
  0x83   :  { %v31_v20 = vpop.permute.xlu0 %30 }
  0x84   :  { %v743_v21 = vmul.f32 %v515_v19, %v31_v20 }
  0x86   :  { %v43_v22 = vand.u32 2139095040, %v743_v21  ;;  %v40_v23 = vand.u32 2147483647, %v743_v21  ;;  %vm42_vm7 = vcmp.lt.s32.totalorder %v743_v21, 0  ;;  %vm132_vm15 = vweird.f32 %v743_v21 }
  0x88   :  { %v44_v24 = vshrl.u32 %v43_v22, 23  ;;  %v47_v26 = vand.u32 8388607, %v40_v23  ;;  %vm41_vm8 = vcmp.le.f32.partialorder %v40_v23, 0.7853982 }
  0x8a   :  { %v516_v25 = vadd.s32 4294967169, %v44_v24  ;;  %v48_v29 = vor.u32 8388608, %v47_v26 }
  0x8c   :  { %v50_v27 = vadd.s32 1, %v516_v25  ;;  %v88_v37 = vshll.u32 %v48_v29, 8 }
  0x8e   :  { %vm51_vm0 = vcmp.gt.s32.totalorder %v50_v27, 0 }
  0x8f   :  { %v52_v28 = vsel %vm51_vm0, %v50_v27, 0  ;;  %vm652_vm0 = vmmov 0  }
  0x90   :  { %v54_v30 = vand.u32 31, %v52_v28  ;;  %v53_v31 = vshrl.u32 %v52_v28, 5 }
  0x92   :  { %v55_v32 = vsub.s32 32, %v54_v30  ;;  %v66_v34 = vshll.u32 %v645_v33, %v54_v30  ;;  %v69_v36 = vshll.u32 %v646_v35, %v54_v30  ;;  %v57_v42 = vshll.u32 %v648_v41, %v54_v30 }
  0x93   :  { %v60_v45 = vshll.u32 %v649_v43, %v54_v30  ;;  %v63_v48 = vshll.u32 %v650_v46, %v54_v30  ;;  %vm75_vm1 = vcmp.lt.s32.totalorder %v53_v31, 4  ;;  %vm72_vm2 = vcmp.lt.s32.totalorder %v53_v31, 1 }
  0x94   :  { %v67_v38 = vshrl.u32 %v646_v35, %v55_v32  ;;  %v70_v40 = vshrl.u32 %v647_v39, %v55_v32  ;;  %v58_v44 = vshrl.u32 %v649_v43, %v55_v32  ;;  %v61_v47 = vshrl.u32 %v650_v46, %v55_v32 }
  0x95   :  { %v64_v49 = vshrl.u32 %v645_v33, %v55_v32  ;;  %v56_v53 = vshrl.u32 %v648_v41, %v55_v32  ;;  %vm73_vm3 = vcmp.lt.s32.totalorder %v53_v31, 2  ;;  %vm74_vm4 = vcmp.lt.s32.totalorder %v53_v31, 3 }
  0x96   :  { %v68_v50 = vor.u32 %v67_v38, %v66_v34  ;;  %v71_v51 = vor.u32 %v70_v40, %v69_v36  ;;  %v59_v52 = vor.u32 %v58_v44, %v57_v42  ;;  %v62_v54 = vor.u32 %v61_v47, %v60_v45 }
  0x97   :  { %v65_v55 = vor.u32 %v64_v49, %v63_v48 }
  0x98   :  { %v81_v56 = vsel %vm75_vm1, %v68_v50, 920167782  ;;  %v85_v57 = vsel %vm75_vm1, %v71_v51, 1326507024  ;;  %v80_v59 = vsel %vm72_vm2, %v59_v52, %v62_v54  ;;  %v76_v62 = vsel %vm72_vm2, %v56_v53, %v59_v52 }
  0x99   :  { %v77_v58 = vsel %vm75_vm1, %v65_v55, 2102212464  ;;  %v82_v60 = vsel %vm74_vm4, %v65_v55, %v81_v56  ;;  %v84_v61 = vsel %vm72_vm2, %v62_v54, %v65_v55  ;;  %v86_v1 = vsel %vm74_vm4, %v68_v50, %v85_v57  ;;  %v610_v57 = vld [vmem:[%s792_s4] sm:$0xff]  }
  0x9a   :  { %v78_v63 = vsel %vm74_vm4, %v62_v54, %v77_v58  ;;  %v83_v0 = vsel %vm73_vm3, %v80_v59, %v82_v60  ;;  %v87_v2 = vsel %vm73_vm3, %v84_v61, %v86_v1  ;;  %v651_v58 = vmov 0.0   ;;  %v524_v60 = vld [vmem:[%s791_s3] ss:$0 sm:$0xff]  ;;  %s653_s3 = smov [#allocation2]  }
  0x9b   :  { %v749_v3 = vmul.u32.u64.low %v88_v37, %v83_v0  ;;  %v750_v4 = vmul.u32.u64.high %v88_v37, %v83_v0, %v749_v3  ;;  %v752_v5 = vmul.u32.u64.low %v88_v37, %v87_v2  ;;  %v753_v6 = vmul.u32.u64.high %v88_v37, %v87_v2, %v752_v5  ;;  %571 = vmatprep.subr.bf16.mxu1 %v651_v58  ;;  %575 = vmatprep.mubr.msk.bf16.mxu1 %vm652_vm0, %v651_v58  ;;  %s507_s12 = sshll.u32 %s653_s3, 4  ;;  %s508_s12 = int_to_ptr.vmem [resolvable:$true] %s507_s12 }
  0x9c   :  { %v79_v7 = vsel %vm73_vm3, %v76_v62, %v78_v63  ;;  %572 = vmatpush3.bf16.msra.mxu1 %v610_v57  ;;  %vm455_vm1 = vcmask 261120   ;;  %vm499_vm2 = vcmask 254976   ;;  %s620_s13 = scalar_lea.vmem %s508_s12, 32  ;;  %p625_p1 = scmp.lt.s32.totalorder %s508_s12, %s508_s12 }
  0x9d   :  { %v98_v8 = vadd.s32 1, %v750_v4  ;;  %v95_v9 = vmul.u32 %v88_v37, %v79_v7  ;;  %vm97_vm5 = vc.u32 %v753_v6, %v749_v3  ;;  %v96_v22 = vadd.s32 %v749_v3, %v753_v6  ;;  %573 = vmatprep.subr.bf16.mxu1 %v651_v58  ;;  %p621_p0 = scmp.ne.s32.totalorder %s508_s12, %s620_s13  ;;  %p626_p2 = scmp.lt.s32.totalorder %s620_s13, %s620_s13 }
  0x9f   :  { %v99_v10 = vsel %vm97_vm5, %v98_v8, %v750_v4  ;;  %v542_v8 = vld [vmem:[%s793_s5] ss:$0 sm:$0xff]  ;;  %p627_p3 = por %p626_p2, %p625_p1 }
  0xa0   :  { %v100_v11 = vadd.s32 %v99_v10, %v95_v9 }
  0xa1   :  { %p628_p4 = pnand %p627_p3, %p621_p0 }
  0xa2   :  { %v101_v12 = vadd.s32 536870912, %v100_v11 }
  0xa4   :  { %v102_v13 = vshrl.u32 %v101_v12, 30 }
  0xa6   :  { %v103_v14 = vshll.u32 %v102_v13, 30  ;;  %v126_v35 = vsub.s32 4, %v102_v13 }
  0xa8   :  { %v104_v15 = vsub.s32 %v100_v11, %v103_v14  ;;  %v127_v38 = vsel %vm42_vm7, %v126_v35, %v102_v13 }
  0xa9   :  { %v129_v40 = vsel %vm41_vm8, 0, %v127_v38 }
  0xaa   :  { %v106_v16 = vsub.s32 0, %v104_v15  ;;  %v133_v41 = vadd.s32 3, %v129_v40  ;;  %v237_v43 = vand.u32 3, %v129_v40 }
  0xac   :  { %v517_v17 = vmin.u32 %v106_v16, %v104_v15  ;;  %v134_v42 = vand.u32 3, %v133_v41  ;;  %vm242_vm10 = vcmp.eq.s32.totalorder %v237_v43, 2  ;;  %vm239_vm12 = vcmp.eq.s32.totalorder %v237_v43, 0 }
  0xad   :  { %vm238_vm14 = vcmp.lt.s32.totalorder %v237_v43, 2 }
  0xae   :  { %v108_v18 = vclz %v517_v17  ;;  %vm139_vm9 = vcmp.eq.s32.totalorder %v134_v42, 2  ;;  %vm136_vm11 = vcmp.eq.s32.totalorder %v134_v42, 0  ;;  %vm135_vm13 = vcmp.lt.s32.totalorder %v134_v42, 2 }
  0xb0   :  { %v518_v19 = vadd.s32 4294967294, %v108_v18 }
  0xb2   :  { %vm519_vm6 = vcmp.lt.s32.totalorder %v518_v19, 0 }
  0xb3   :  { %v111_v20 = vsel %vm519_vm6, 0, %v518_v19 }
  0xb4   :  { %v112_v24 = vsub.s32 32, %v111_v20  ;;  %v116_v25 = vsub.s32 4294967266, %v111_v20  ;;  %v113_v26 = vshll.u32 %v104_v15, %v111_v20 }
  0xb6   :  { %v114_v27 = vshrl.u32 %v96_v22, %v112_v24  ;;  %v117_v28 = vadd.s32 127, %v116_v25 }
  0xb8   :  { %v115_v29 = vor.u32 %v114_v27, %v113_v26  ;;  %v118_v30 = vshll.u32 %v117_v28, 23 }
  0xba   :  { %v119_v31 = vor.u32 4788187, %v118_v30  ;;  %v122_v33 = vcvt.s32.f32 %v115_v29 }
  0xbc   :  { %v120_v32 = vand.u32 2147483647, %v119_v31 }
  0xbe   :  { %v123_v34 = vmul.f32 %v122_v33, %v120_v32 }
  0xc0   :  { %v124_v36 = vxor.u32 2147483648, %v123_v34 }
  0xc2   :  { %v125_v37 = vsel %vm42_vm7, %v124_v36, %v123_v34 }
  0xc3   :  { %v128_v39 = vsel %vm41_vm8, %v743_v21, %v125_v37  ;;  %v611_v21 = vld [vmem:[%s792_s4 + $0x8] sm:$0xff]  }
  0xc4   :  { %612 = vcosq.f32 %v128_v39  ;;  %574 = vmatpush3.bf16.msra.mxu1 %v611_v21 }
  0xc5   :  { %614 = vsinq.f32 %v128_v39 }
  0xce   :  { %v613_v44 = vpop.eup %612 }
  0xcf   :  { %v615_v45 = vpop.eup %614  ;;  %v140_v46 = vxor.u32 2147483648, %v613_v44 }
  0xd0   :  { %v137_v47 = vxor.u32 2147483648, %v615_v45 }
  0xd1   :  { %v141_v48 = vsel %vm139_vm9, %v140_v46, %v615_v45  ;;  %v244_v23 = vsel %vm242_vm10, %v140_v46, %v615_v45 }
  0xd2   :  { %v138_v49 = vsel %vm136_vm11, %v613_v44, %v137_v47  ;;  %v241_v50 = vsel %vm239_vm12, %v613_v44, %v137_v47 }
  0xd3   :  { %v142_v51 = vsel %vm135_vm13, %v138_v49, %v141_v48  ;;  %v245_v52 = vsel %vm238_vm14, %v241_v50, %v244_v23 }
  0xd4   :  { %v143_v53 = vsel %vm132_vm15, nan, %v142_v51  ;;  %v246_v54 = vsel %vm132_vm15, nan, %v245_v52 }
  0xd5   :  { %v247_v55 = vpack.c.bf16 %v143_v53, %v143_v53  ;;  %v248_v56 = vpack.c.bf16 %v246_v54, %v246_v54 }
  0xd7   :  { %416 = vmatprep.mubr.bf16.mxu0 %v248_v56 }
  0xd8   :  { %417 = vmatmul.mubr.bf16.vlgmr.msra.gmra.mrb[0].mxu0 %v247_v55 }
 0x1ab   :  { %v562_v59 = vpop.f32.mrb[0].mxu0 }
 0x1ac   :  { %v563_v61 = vpop.f32.mrb[1].mxu0 }
 0x1ad   :  { %v564_v62 = vadd.f32 %v563_v61, %v562_v59  ;;  %v565_v63 = vpop.f32.mrb[2].mxu0 }
 0x1ae   :  { %v566_v0 = vpop.f32.mrb[3].mxu0 }
 0x1af   :  { %v419_v1 = vadd.f32 %v564_v62, %v524_v60 }
 0x1b1   :  { %v541_v2 = vmul.f32 -1.442695, %v419_v1 }
 0x1b3   :  { %616 = vpow2.f32 %v541_v2 }
 0x1bd   :  { %v617_v3 = vpop.eup %616 }
 0x1be   :  { %v427_v4 = vadd.f32 1.0, %v617_v3 }
 0x1c0   :  { %618 = vrcp.f32 %v427_v4 }
 0x1ca   :  { %v619_v5 = vpop.eup %618 }
 0x1cb   :  { %v430_v6 = vmul.f32 %v619_v5, %v419_v1 }
 0x1cd   :  { %v431_v7 = vpack.c.bf16 %v430_v6, %v430_v6 }
 0x1cf   :  { %576 = vmatmul.mubr.msk.bf16.vlgmr.msra.gmra.mrb[0].mxu1 %vm455_vm1, %v431_v7 }
 0x2a2   :  { %v493_v9 = vpop.f32.mrb[0].mxu1 }
 0x2a3   :  { %v494_v10 = vadd.f32 %v542_v8, %v493_v9  ;;  %v577_v11 = vpop.f32.mrb[1].mxu1 }
 0x2a4   :  { %v496_v12 = vpop.f32.mrb[2].mxu1 }
 0x2a5   :  { %v578_v13 = vpop.f32.mrb[3].mxu1  ;;  %500 = vst.msk [vmem:[#allocation2] sm:$0x3] %vm499_vm2, %v494_v10 }
 0x2a6   :  { %631 = shalt.err (!%p628_p4)
}
 0x2a7   :  { %s632_s5 = scalar_lea.hbm %s794_s6, 32 }
 0x2a8   :  { %p633_p5 = scmp.ne.s32.totalorder %s794_s6, %s632_s5  ;;  %p636_p6 = scmp.lt.u32.totalorder %s632_s5, %s794_s6 }
 0x2aa   :  { %p638_p7 = pnand %p636_p6, %p633_p5 }
 0x2ac   :  { %641 = shalt.err (!%p638_p7)
}
 0x2ad   :  { %510 = dma.vmem_to_hbm [thread:$0]  %s508_s12, 32, %s794_s6, [#allocation3]  }
 0x2ae   :  { %642 = dma.done.wait [#allocation3], 32  }
 0x2af   :  { %643 = vsyncadd [#allocation3], 4294967264 }
 0x2b0   :  { %514 = vsyncpa [#allocation3], 1 }

</bundles_post_ra>
